<compile_context>
chip_gen: v6e
topology: v6e:2x2x1
jax: 0.10.0
libtpu: 0.0.40
codegen_flags: <defaults>
</compile_context>

<pallas_src>
import functools
import math

import jax
import jax.numpy as jnp
from jax.experimental import pallas as pl
from jax.experimental.pallas import tpu as pltpu

_LANES = 128
# exp(-30000) underflows to exactly 0 in f16/bf16/f32 -> padded elements contribute exactly 0.
_NEG_LOGIT = -30000.0


def _round_up(x, m):
    return ((x + m - 1) // m) * m


def _cdiv(a, b):
    return -(-a // b)


def _wbfl_kernel(x_ref, t_ref, w_ref, o_ref, *, alpha: float, gamma: float, lane: int):
    i = pl.program_id(1)

    @pl.when(i == 0)
    def _init():
        o_ref[...] = jnp.zeros_like(o_ref)

    x = x_ref[...].astype(jnp.float32)
    t = t_ref[...].astype(jnp.float32)
    w = w_ref[...].astype(jnp.float32)          # (1, lane), broadcasts over rows

    # Fused stable sigmoid + BCE-with-logits sharing e = exp(-|x|):
    #   ce = max(x, 0) - x*t + log1p(e)
    #   p  = sigmoid(x) = 1/(1+e)  for x >= 0,   e/(1+e) = 1 - 1/(1+e)  otherwise
    e = jnp.exp(-jnp.abs(x))
    ce = jnp.maximum(x, 0.0) - x * t + jnp.log1p(e)
    sig_abs = 1.0 / (1.0 + e)
    p = jnp.where(x >= 0.0, sig_abs, 1.0 - sig_abs)

    p_t = p * t + (1.0 - p) * (1.0 - t)
    d = 1.0 - p_t

    # (1 - p_t) ** gamma without the exp/log pow path for integer gamma.
    g = float(gamma)
    if g == 2.0:
        mod = d * d
    elif g.is_integer() and 0.0 <= g <= 8.0:
        mod = jnp.ones_like(d)
        for _ in range(int(g)):
            mod = mod * d
    else:
        mod = jnp.power(jnp.maximum(d, 0.0), g)

    loss = ce * mod
    if alpha >= 0:
        alpha_t = alpha * t + (1.0 - alpha) * (1.0 - t)
        loss = alpha_t * loss
    loss = loss * w                              # per-attribute weight

    # VALU-only partial reduction into the resident (8, lane) output/accumulator tile.
    o_ref[...] += jnp.sum(loss.reshape(-1, 8, lane), axis=0)


def weighted_binary_focal_loss_with_logits_pallas(inputs, targets, weight,
                                                  alpha: float = -1.0,
                                                  gamma: float = 2.0,
                                                  reduction: str = "mean"):
    if reduction not in ("mean", "sum"):
        # TODO(synk): reduction='none' (elementwise output) needs a tiled output BlockSpec;
        # only 'mean'/'sum' are implemented here.
        raise ValueError(f"Unsupported reduction '{reduction}'")

    c = inputs.shape[-1]
    if tuple(weight.shape) != (c,):
        raise ValueError("weight must be 1-D with size == inputs.shape[-1]")

    n_rows = int(math.prod(inputs.shape[:-1]))
    n = n_rows * c

    x = inputs.reshape(n_rows, c)
    t = targets.reshape(n_rows, c)

    # Lane packing: fold attributes into the 128-lane axis when possible, else pad columns.
    if c <= _LANES and _LANES % c == 0:
        fold = _LANES // c
        lane = _LANES
        col_pad = 0
        w_lane = jnp.tile(weight.astype(jnp.float32), fold).reshape(1, lane)
    else:
        fold = 1
        lane = _round_up(c, _LANES)
        col_pad = lane - c
        w_lane = jnp.pad(weight.astype(jnp.float32), (0, col_pad)).reshape(1, lane)

    rows_folded = _cdiv(n_rows, fold)

    # Big row blocks, budgeted to ~4 MiB of x+t per buffer set (~8 MiB double-buffered),
    # comfortably under every generation's default scoped-VMEM limit.
    per_row_bytes = lane * (inputs.dtype.itemsize + targets.dtype.itemsize)
    max_block_rows = min(4 * 1024 * 1024 // max(per_row_bytes, 1), 4096)
    max_block_rows = max(32, (max_block_rows // 32) * 32)

    # Outer "parallel" split so v7x megacore can shard the reduction; only when there is
    # more than one block of work. Harmless (serial) on 1-TC chips.
    num_splits = 2 if rows_folded > max_block_rows else 1

    rows_per_split = _cdiv(rows_folded, num_splits)
    steps = max(1, _cdiv(rows_per_split, max_block_rows))
    block_rows = _round_up(_cdiv(rows_per_split, steps), 32)
    rows_final = block_rows * num_splits * steps

    row_pad = rows_final * fold - n_rows
    if row_pad or col_pad:
        # Padded logits = large negative, padded targets = 0  ->  focal loss exactly 0 there,
        # so no mask stream is needed. Padded weight lanes are 0 as well.
        x = jnp.pad(x, ((0, row_pad), (0, col_pad)), constant_values=_NEG_LOGIT)
        t = jnp.pad(t, ((0, row_pad), (0, col_pad)), constant_values=0)
    x = x.reshape(rows_final, lane)
    t = t.reshape(rows_final, lane)

    kernel = functools.partial(_wbfl_kernel, alpha=float(alpha), gamma=float(gamma), lane=lane)

    partials = pl.pallas_call(
        kernel,
        out_shape=jax.ShapeDtypeStruct((num_splits * 8, lane), jnp.float32),
        grid_spec=pltpu.PrefetchScalarGridSpec(
            num_scalar_prefetch=0,
            grid=(num_splits, steps),
            in_specs=[
                pl.BlockSpec((block_rows, lane), lambda s, i: (s * steps + i, 0)),
                pl.BlockSpec((block_rows, lane), lambda s, i: (s * steps + i, 0)),
                pl.BlockSpec((1, lane), lambda s, i: (0, 0)),
            ],
            out_specs=pl.BlockSpec((8, lane), lambda s, i: (s, 0)),
        ),
        compiler_params=pltpu.CompilerParams(
            dimension_semantics=("parallel", "arbitrary"),
            vmem_limit_bytes=32 * 1024 * 1024,
        ),
    )(x, t, w_lane)

    total = jnp.sum(partials)
    if reduction == "mean":
        return total / jnp.float32(n)
    return total


class WeightedBinaryFocalLossWithLogits:
    """JAX/Pallas port of the PyTorch module (weight derived from freq_hist)."""

    def __init__(self, freq_hist, alpha: float = -1.0, gamma: float = 2.0,
                 reduction: str = "mean"):
        w = jnp.exp(-freq_hist)
        w = w * (w.shape[0] / jnp.sum(w))
        self.weight = w
        self.alpha = alpha
        self.gamma = gamma
        self.reduction = reduction

    def __call__(self, input, target):
        return weighted_binary_focal_loss_with_logits_pallas(
            input, target, self.weight, self.alpha, self.gamma, self.reduction)


def _reference(inputs, targets, weight, alpha=-1.0, gamma=2.0, reduction="mean"):
    p = jax.nn.sigmoid(inputs)
    ce = (jnp.maximum(inputs, 0.0) - inputs * targets
          + jnp.log1p(jnp.exp(-jnp.abs(inputs))))
    p_t = p * targets + (1 - p) * (1 - targets)
    loss = ce * (1 - p_t) ** gamma
    if alpha >= 0:
        alpha_t = alpha * targets + (1 - alpha) * (1 - targets)
        loss = alpha_t * loss
    loss = weight * loss
    if reduction == "mean":
        return loss.mean()
    if reduction == "sum":
        return loss.sum()
    return loss


if __name__ == "__main__":
    key = jax.random.PRNGKey(0)
    k1, k2, k3 = jax.random.split(key, 3)
    # Attribute-classification layout: (batch, num_attributes), per-attribute freq_hist.
    B, A = 16, 32
    x = jax.random.normal(k1, (B, A), dtype=jnp.float32)
    tgt = (jax.random.uniform(k2, (B, A)) > 0.5).astype(jnp.float32)
    freq_hist = jax.random.uniform(k3, (A,), dtype=jnp.float32)

    # Module defaults: alpha=-1, gamma=2, reduction='mean'
    mod = WeightedBinaryFocalLossWithLogits(freq_hist, alpha=-1.0, gamma=2.0, reduction="mean")
    out = jax.block_until_ready(mod(x, tgt))
    ref = _reference(x, tgt, mod.weight, alpha=-1.0, gamma=2.0, reduction="mean")
    assert jnp.allclose(out, ref, rtol=1e-5, atol=1e-6), (out, ref)

    # Also exercise the alpha>=0 and 'sum' paths.
    mod2 = WeightedBinaryFocalLossWithLogits(freq_hist, alpha=0.25, gamma=2.0, reduction="sum")
    out2 = jax.block_until_ready(mod2(x, tgt))
    ref2 = _reference(x, tgt, mod2.weight, alpha=0.25, gamma=2.0, reduction="sum")
    assert jnp.allclose(out2, ref2, rtol=1e-5, atol=1e-5), (out2, ref2)

    print("KERNEL_OK")
</pallas_src>

<mosaic_0001>
module attributes {stable_mosaic.version = 11 : i64} {
  func.func @_wbfl_kernel(%arg0: i32, %arg1: i32, %arg2: memref<32x128xf32, #tpu.memory_space<vmem>>, %arg3: memref<32x128xf32, #tpu.memory_space<vmem>>, %arg4: memref<1x128xf32, #tpu.memory_space<vmem>>, %arg5: memref<8x128xf32, #tpu.memory_space<vmem>>) attributes {dimension_semantics = [#tpu.dimension_semantics<parallel>, #tpu.dimension_semantics<arbitrary>], iteration_bounds = array<i64: 1, 1>, scalar_prefetch = 0 : i64, scratch_operands = 0 : i64, tpu.core_type = #tpu.core_type<tc>, window_params = [{transform_indices = @transform_0, window_bounds = array<i64: 32, 128>}, {transform_indices = @transform_1, window_bounds = array<i64: 32, 128>}, {pipeline_mode = #tpu.pipeline_mode<synchronous>, transform_indices = @transform_2, window_bounds = array<i64: 1, 128>}, {transform_indices = @transform_3, window_bounds = array<i64: 8, 128>}]} {
    %c0_i32 = arith.constant 0 : i32
    %0 = arith.cmpi eq, %arg1, %c0_i32 : i32
    %1 = arith.extui %0 : i1 to i32
    %c0_i32_0 = arith.constant 0 : i32
    %2 = arith.cmpi ne, %1, %c0_i32_0 : i32
    scf.if %2 {
      %cst_19 = arith.constant 0.000000e+00 : f32
      %43 = vector.broadcast %cst_19 : f32 to vector<8x128xf32>
      %c0_20 = arith.constant 0 : index
      %c0_21 = arith.constant 0 : index
      %44 = vector.load %arg5[%c0_20, %c0_21] : memref<8x128xf32, #tpu.memory_space<vmem>>, vector<8x128xf32>
      tpu.vector_store %arg5[%c0_20, %c0_21], %43 {strides = array<i32>} : memref<8x128xf32, #tpu.memory_space<vmem>>, vector<8x128xf32>,
    } else {
    }
    %c0 = arith.constant 0 : index
    %c0_1 = arith.constant 0 : index
    %3 = vector.load %arg2[%c0, %c0_1] : memref<32x128xf32, #tpu.memory_space<vmem>>, vector<32x128xf32>
    %c0_2 = arith.constant 0 : index
    %c0_3 = arith.constant 0 : index
    %4 = vector.load %arg3[%c0_2, %c0_3] : memref<32x128xf32, #tpu.memory_space<vmem>>, vector<32x128xf32>
    %c0_4 = arith.constant 0 : index
    %c0_5 = arith.constant 0 : index
    %5 = vector.load %arg4[%c0_4, %c0_5] : memref<1x128xf32, #tpu.memory_space<vmem>>, vector<1x128xf32>
    %6 = math.absf %3 : vector<32x128xf32>
    %cst = arith.constant 0.000000e+00 : f32
    %7 = vector.broadcast %cst : f32 to vector<32x128xf32>
    %8 = arith.subf %7, %6 : vector<32x128xf32>
    %9 = math.exp %8 : vector<32x128xf32>
    %cst_6 = arith.constant 0.000000e+00 : f32
    %10 = vector.broadcast %cst_6 : f32 to vector<32x128xf32>
    %11 = arith.maximumf %3, %10 : vector<32x128xf32>
    %12 = arith.mulf %3, %4 : vector<32x128xf32>
    %13 = arith.subf %11, %12 : vector<32x128xf32>
    %14 = math.log1p %9 : vector<32x128xf32>
    %15 = arith.addf %13, %14 : vector<32x128xf32>
    %cst_7 = arith.constant 1.000000e+00 : f32
    %16 = vector.broadcast %cst_7 : f32 to vector<32x128xf32>
    %17 = arith.addf %16, %9 : vector<32x128xf32>
    %cst_8 = arith.constant 1.000000e+00 : f32
    %18 = vector.broadcast %cst_8 : f32 to vector<32x128xf32>
    %19 = arith.divf %18, %17 : vector<32x128xf32>
    %cst_9 = arith.constant 0.000000e+00 : f32
    %20 = vector.broadcast %cst_9 : f32 to vector<32x128xf32>
    %21 = arith.cmpf oge, %3, %20 : vector<32x128xf32>
    %cst_10 = arith.constant 1.000000e+00 : f32
    %22 = vector.broadcast %cst_10 : f32 to vector<32x128xf32>
    %23 = arith.subf %22, %19 : vector<32x128xf32>
    %24 = arith.select %21, %19, %23 : vector<32x128xi1>, vector<32x128xf32>
    %25 = arith.mulf %24, %4 : vector<32x128xf32>
    %cst_11 = arith.constant 1.000000e+00 : f32
    %26 = vector.broadcast %cst_11 : f32 to vector<32x128xf32>
    %27 = arith.subf %26, %24 : vector<32x128xf32>
    %cst_12 = arith.constant 1.000000e+00 : f32
    %28 = vector.broadcast %cst_12 : f32 to vector<32x128xf32>
    %29 = arith.subf %28, %4 : vector<32x128xf32>
    %30 = arith.mulf %27, %29 : vector<32x128xf32>
    %31 = arith.addf %25, %30 : vector<32x128xf32>
    %cst_13 = arith.constant 1.000000e+00 : f32
    %32 = vector.broadcast %cst_13 : f32 to vector<32x128xf32>
    %33 = arith.subf %32, %31 : vector<32x128xf32>
    %34 = arith.mulf %33, %33 : vector<32x128xf32>
    %35 = arith.mulf %15, %34 : vector<32x128xf32>
    %36 = vector.broadcast %5 : vector<1x128xf32> to vector<32x128xf32>
    %37 = arith.mulf %35, %36 : vector<32x128xf32>
    %c0_14 = arith.constant 0 : index
    %c0_15 = arith.constant 0 : index
    %38 = vector.load %arg5[%c0_14, %c0_15] : memref<8x128xf32, #tpu.memory_space<vmem>>, vector<8x128xf32>
    %39 = vector.shape_cast %37 : vector<32x128xf32> to vector<4x8x128xf32>
    %cst_16 = arith.constant dense<0.000000e+00> : vector<8x128xf32>
    %40 = vector.multi_reduction <add>, %39, %cst_16 [0] : vector<4x8x128xf32> to vector<8x128xf32>
    %41 = arith.addf %38, %40 : vector<8x128xf32>
    %c0_17 = arith.constant 0 : index
    %c0_18 = arith.constant 0 : index
    %42 = vector.load %arg5[%c0_17, %c0_18] : memref<8x128xf32, #tpu.memory_space<vmem>>, vector<8x128xf32>
    tpu.vector_store %arg5[%c0_17, %c0_18], %41 {strides = array<i32>} : memref<8x128xf32, #tpu.memory_space<vmem>>, vector<8x128xf32>,
    return
  }
  func.func @transform_0(%arg0: i32, %arg1: i32) -> (i32, i32) {
    %c1_i32 = arith.constant 1 : i32
    %0 = arith.muli %arg0, %c1_i32 : i32
    %1 = arith.addi %0, %arg1 : i32
    %c0_i32 = arith.constant 0 : i32
    %c0_i32_0 = arith.constant 0 : i32
    return %1, %c0_i32 : i32, i32
  }
  func.func @transform_1(%arg0: i32, %arg1: i32) -> (i32, i32) {
    %c1_i32 = arith.constant 1 : i32
    %0 = arith.muli %arg0, %c1_i32 : i32
    %1 = arith.addi %0, %arg1 : i32
    %c0_i32 = arith.constant 0 : i32
    %c0_i32_0 = arith.constant 0 : i32
    return %1, %c0_i32 : i32, i32
  }
  func.func @transform_2(%arg0: i32, %arg1: i32) -> (i32, i32) {
    %c0_i32 = arith.constant 0 : i32
    %c0_i32_0 = arith.constant 0 : i32
    %c0_i32_1 = arith.constant 0 : i32
    return %c0_i32, %c0_i32_0 : i32, i32
  }
  func.func @transform_3(%arg0: i32, %arg1: i32) -> (i32, i32) {
    %c0_i32 = arith.constant 0 : i32
    %c0_i32_0 = arith.constant 0 : i32
    return %arg0, %c0_i32 : i32, i32
  }
}

</mosaic_0001>

<bundles_post_ra>
// kernel: tpu_custom_call.1
= control target key start
LH: loop header
LB: loop body
LE: loop exit
PB: predicated region body
PF: predicated region fallthrough
CT: control target
= control target key end

     0   :  { %8 = vsyncpa [#allocation3], 0  ;;  %s443_s0 = inlined_call_operand.hbm [shape: f32[32,128], index: 0, kind: input, shape index: {}]   ;;  %s444_s1 = inlined_call_operand.hbm [shape: f32[32,128], index: 1, kind: input, shape index: {}]   ;;  %s445_s2 = inlined_call_operand.vmem [shape: f32[1,128], index: 2, kind: input, shape index: {}]   ;;  %s446_s3 = inlined_call_operand.hbm [shape: f32[8,128], index: 3, kind: output, shape index: {}]  }
   0x1   :  { %9 = vsyncpa [#allocation6], 0 }
   0x2   :  { %10 = vsyncpa [#allocation4], 0  ;;  %s322_s12 = smov [#allocation2]  }
   0x3   :  { %s20_s13 = sshll.u32 %s322_s12, 4  ;;  %s21_s13 = int_to_ptr.vmem [resolvable:$true] %s20_s13 }
   0x4   :  { %s264_s14 = scalar_lea.vmem %s21_s13, 512  ;;  %p269_p1 = scmp.lt.s32.totalorder %s21_s13, %s21_s13 }
   0x5   :  { %p265_p0 = scmp.ne.s32.totalorder %s21_s13, %s264_s14  ;;  %p270_p2 = scmp.lt.s32.totalorder %s264_s14, %s264_s14 }
   0x7   :  { %p271_p3 = por %p270_p2, %p269_p1 }
   0x9   :  { %p272_p4 = pnand %p271_p3, %p265_p0 }
   0xb   :  { %275 = shalt.err (!%p272_p4)
}
   0xc   :  { %s323_s15 = smov 128   ;;  %s324_s16 = smov 8  }
   0xd   :  { %26 = dma.hbm_to_vmem [thread:$0]  %s443_s0, 512, %s21_s13, [#allocation3], %s323_s15, %s323_s15, %s324_s16  }
   0xe   :  { %s325_s19 = smov [#allocation5]  }
   0xf   :  { %s36_s20 = sshll.u32 %s325_s19, 4  ;;  %s37_s20 = int_to_ptr.vmem [resolvable:$true] %s36_s20 }
  0x10   :  { %s284_s21 = scalar_lea.vmem %s37_s20, 512  ;;  %p289_p6 = scmp.lt.s32.totalorder %s37_s20, %s37_s20 }
  0x11   :  { %p285_p5 = scmp.ne.s32.totalorder %s37_s20, %s284_s21  ;;  %p290_p7 = scmp.lt.s32.totalorder %s284_s21, %s284_s21 }
  0x13   :  { %p291_p8 = por %p290_p7, %p289_p6 }
  0x15   :  { %p292_p9 = pnand %p291_p8, %p285_p5 }
  0x17   :  { %295 = shalt.err (!%p292_p9)
}
  0x18   :  { %42 = dma.hbm_to_vmem [thread:$0]  %s444_s1, 512, %s37_s20, [#allocation6], %s323_s15, %s323_s15, %s324_s16  }
  0x19   :  { %316 = dma.done.wait [#allocation3], 512  }
  0x1a   :  { %317 = vsyncadd [#allocation3], 4294966784 }
  0x1b   :  { %318 = dma.done.wait [#allocation6], 512  }
  0x1c   :  { %319 = vsyncadd [#allocation6], 4294966784  ;;  %v353_v0 = vld [vmem:[#allocation2] sm:$0xff]  ;;  %v355_v1 = vld [vmem:[#allocation2 + $0x8] sm:$0xff]  ;;  %s326_s24 = smov [#allocation7]  }
  0x1d   :  { %v357_v2 = vld [vmem:[#allocation2 + $0x10] sm:$0xff]  ;;  %v359_v3 = vld [vmem:[#allocation2 + $0x18] sm:$0xff]  ;;  %v69_v4 = vand.u32 2147483647, %v353_v0  ;;  %v70_v5 = vand.u32 2147483647, %v355_v1 }
  0x1e   :  { %v71_v6 = vand.u32 2147483647, %v357_v2  ;;  %v72_v7 = vand.u32 2147483647, %v359_v3  ;;  %v365_v24 = vld [vmem:[#allocation5] sm:$0xff]  ;;  %v367_v25 = vld [vmem:[#allocation5 + $0x8] sm:$0xff] }
  0x1f   :  { %v73_v8 = vsub.f32 0.0, %v69_v4  ;;  %v74_v9 = vsub.f32 0.0, %v70_v5  ;;  %v85_v26 = vmax.f32 %v353_v0, 0.0  ;;  %v89_v27 = vmul.f32 %v365_v24, %v353_v0  ;;  %v375_v33 = vld [vmem:[#allocation5 + $0x10] sm:$0xff]  ;;  %v377_v34 = vld [vmem:[#allocation5 + $0x18] sm:$0xff]  ;;  %s215_s25 = sshll.u32 %s326_s24, 4  ;;  %s216_s25 = int_to_ptr.vmem [resolvable:$true] %s215_s25 }
  0x20   :  { %v75_v10 = vsub.f32 0.0, %v71_v6  ;;  %v76_v11 = vsub.f32 0.0, %v72_v7  ;;  %v86_v28 = vmax.f32 %v355_v1, 0.0  ;;  %v90_v29 = vmul.f32 %v367_v25, %v355_v1  ;;  %p301_p11 = scmp.lt.s32.totalorder %s216_s25, %s216_s25 }
  0x21   :  { %v77_v12 = vmul.f32 1.442695, %v73_v8  ;;  %v79_v13 = vmul.f32 1.442695, %v74_v9  ;;  %v87_v35 = vmax.f32 %v357_v2, 0.0  ;;  %v88_v37 = vmax.f32 %v359_v3, 0.0 }
  0x22   :  { %v81_v14 = vmul.f32 1.442695, %v75_v10  ;;  %v83_v15 = vmul.f32 1.442695, %v76_v11  ;;  %v91_v38 = vmul.f32 %v375_v33, %v357_v2  ;;  %v92_v39 = vmul.f32 %v377_v34, %v359_v3 }
  0x23   :  { %232 = vpow2.f32 %v77_v12  ;;  %v385_v40 = vsub.f32 %v85_v26, %v89_v27  ;;  %v387_v42 = vsub.f32 %v86_v28, %v90_v29  ;;  %vm149_vm0 = vcmp.ge.f32.partialorder %v353_v0, 0.0 }
  0x24   :  { %234 = vpow2.f32 %v79_v13  ;;  %vm150_vm1 = vcmp.ge.f32.partialorder %v355_v1, 0.0  ;;  %vm151_vm2 = vcmp.ge.f32.partialorder %v357_v2, 0.0  ;;  %vm152_vm3 = vcmp.ge.f32.partialorder %v359_v3, 0.0 }
  0x25   :  { %236 = vpow2.f32 %v81_v14  ;;  %v169_v54 = vsub.f32 1.0, %v365_v24  ;;  %v170_v55 = vsub.f32 1.0, %v367_v25  ;;  %v171_v56 = vsub.f32 1.0, %v375_v33 }
  0x26   :  { %238 = vpow2.f32 %v83_v15  ;;  %v172_v61 = vsub.f32 1.0, %v377_v34 }
  0x30   :  { %v233_v16 = vpop.eup %232 }
  0x31   :  { %v235_v17 = vpop.eup %234  ;;  %v97_v19 = vadd.f32 1.0, %v233_v16  ;;  %v100_v30 = vmul.f32 -0.5, %v233_v16  ;;  %v103_v44 = vand.u32 2147483647, %v233_v16 }
  0x32   :  { %v237_v18 = vpop.eup %236  ;;  %v106_v21 = vadd.f32 1.0, %v235_v17  ;;  %v109_v31 = vmul.f32 -0.5, %v235_v17  ;;  %v112_v45 = vand.u32 2147483647, %v235_v17 }
  0x33   :  { %v239_v20 = vpop.eup %238  ;;  %240 = vlog2.f32 %v97_v19  ;;  %v115_v22 = vadd.f32 1.0, %v237_v18  ;;  %v118_v32 = vmul.f32 -0.5, %v237_v18  ;;  %v101_v43 = vadd.f32 1.0, %v100_v30 }
  0x34   :  { %242 = vlog2.f32 %v106_v21  ;;  %v124_v23 = vadd.f32 1.0, %v239_v20  ;;  %v127_v36 = vmul.f32 -0.5, %v239_v20  ;;  %v110_v47 = vadd.f32 1.0, %v109_v31 }
  0x35   :  { %244 = vlog2.f32 %v115_v22  ;;  %v119_v48 = vadd.f32 1.0, %v118_v32  ;;  %v121_v49 = vand.u32 2147483647, %v237_v18  ;;  %v130_v52 = vand.u32 2147483647, %v239_v20 }
  0x36   :  { %246 = vlog2.f32 %v124_v23  ;;  %v128_v51 = vadd.f32 1.0, %v127_v36  ;;  %v102_v58 = vmul.f32 %v233_v16, %v101_v43  ;;  %vm396_vm4 = vcmp.lt.f32.partialorder %v103_v44, 0.0004427343 }
  0x37   :  { %248 = vrcp.f32 %v97_v19  ;;  %vm400_vm5 = vcmp.lt.f32.partialorder %v112_v45, 0.0004427343  ;;  %v111_v63 = vmul.f32 %v235_v17, %v110_v47  ;;  %v120_v4 = vmul.f32 %v237_v18, %v119_v48 }
  0x38   :  { %250 = vrcp.f32 %v106_v21  ;;  %vm405_vm6 = vcmp.lt.f32.partialorder %v121_v49, 0.0004427343  ;;  %v129_v9 = vmul.f32 %v239_v20, %v128_v51  ;;  %vm409_vm7 = vcmp.lt.f32.partialorder %v130_v52, 0.0004427343 }
  0x39   :  { %252 = vrcp.f32 %v115_v22  ;;  %v95_v32 = vsub.f32 %v87_v35, %v91_v38 }
  0x3a   :  { %254 = vrcp.f32 %v124_v23 }
  0x40   :  { %v241_v41 = vpop.eup %240 }
  0x41   :  { %v243_v46 = vpop.eup %242  ;;  %v99_v8 = vmul.f32 0.6931472, %v241_v41  ;;  %v96_v41 = vsub.f32 %v88_v37, %v92_v39  ;;  %v225_v37 = vld [vmem:[%s445_s2] ss:$0 sm:$0xff]  ;;  %s296_s2 = scalar_lea.vmem %s216_s25, 128 }
  0x42   :  { %v245_v50 = vpop.eup %244  ;;  %v108_v13 = vmul.f32 0.6931472, %v243_v46  ;;  %p297_p10 = scmp.ne.s32.totalorder %s216_s25, %s296_s2  ;;  %p302_p12 = scmp.lt.s32.totalorder %s296_s2, %s296_s2 }
  0x43   :  { %v247_v53 = vpop.eup %246  ;;  %v117_v14 = vmul.f32 0.6931472, %v245_v50  ;;  %v105_v1 = vsel %vm396_vm4, %v102_v58, %v99_v8 }
  0x44   :  { %v249_v57 = vpop.eup %248  ;;  %v126_v20 = vmul.f32 0.6931472, %v247_v53  ;;  %v114_v2 = vsel %vm400_vm5, %v111_v63, %v108_v13  ;;  %p303_p13 = por %p302_p12, %p301_p11 }
  0x45   :  { %v251_v62 = vpop.eup %250  ;;  %v153_v6 = vsub.f32 1.0, %v249_v57  ;;  %v134_v38 = vadd.f32 %v114_v2, %v387_v42 }
  0x46   :  { %v253_v7 = vpop.eup %252  ;;  %v154_v11 = vsub.f32 1.0, %v251_v62  ;;  %v132_v45 = vsel %vm409_vm7, %v129_v9, %v126_v20  ;;  %p304_p0 = pnand %p303_p13, %p297_p10 }
  0x47   :  { %v255_v12 = vpop.eup %254  ;;  %v155_v15 = vsub.f32 1.0, %v253_v7  ;;  %v157_v16 = vsel %vm149_vm0, %v249_v57, %v153_v6  ;;  %v136_v39 = vadd.f32 %v132_v45, %v96_v41 }
  0x48   :  { %v156_v17 = vsub.f32 1.0, %v255_v12  ;;  %v158_v18 = vsel %vm150_vm1, %v251_v62, %v154_v11  ;;  %v161_v19 = vmul.f32 %v157_v16, %v365_v24  ;;  %v165_v21 = vsub.f32 1.0, %v157_v16 }
  0x49   :  { %v159_v22 = vsel %vm151_vm2, %v253_v7, %v155_v15  ;;  %v162_v23 = vmul.f32 %v158_v18, %v367_v25  ;;  %v166_v26 = vsub.f32 1.0, %v158_v18 }
  0x4a   :  { %v160_v27 = vsel %vm152_vm3, %v255_v12, %v156_v17  ;;  %v163_v0 = vmul.f32 %v159_v22, %v375_v33  ;;  %v167_v28 = vsub.f32 1.0, %v159_v22  ;;  %v173_v29 = vmul.f32 %v169_v54, %v165_v21 }
  0x4b   :  { %v164_v24 = vmul.f32 %v160_v27, %v377_v34  ;;  %v168_v30 = vsub.f32 1.0, %v160_v27  ;;  %v174_v31 = vmul.f32 %v170_v55, %v166_v26  ;;  %v123_v33 = vsel %vm405_vm6, %v120_v4, %v117_v14 }
  0x4c   :  { %v175_v25 = vmul.f32 %v171_v56, %v167_v28  ;;  %v177_v36 = vadd.f32 %v173_v29, %v161_v19  ;;  %v133_v34 = vadd.f32 %v105_v1, %v385_v40  ;;  %v135_v49 = vadd.f32 %v123_v33, %v95_v32 }
  0x4d   :  { %v176_v43 = vmul.f32 %v172_v61, %v168_v30  ;;  %v178_v44 = vadd.f32 %v174_v31, %v162_v23 }
  0x4e   :  { %v179_v46 = vadd.f32 %v175_v25, %v163_v0  ;;  %v181_v35 = vsub.f32 1.0, %v177_v36 }
  0x4f   :  { %v180_v47 = vadd.f32 %v176_v43, %v164_v24  ;;  %v182_v48 = vsub.f32 1.0, %v178_v44 }
  0x50   :  { %v183_v50 = vsub.f32 1.0, %v179_v46  ;;  %v185_v3 = vmul.f32 %v181_v35, %v181_v35 }
  0x51   :  { %v184_v51 = vsub.f32 1.0, %v180_v47  ;;  %v186_v52 = vmul.f32 %v182_v48, %v182_v48 }
  0x52   :  { %v187_v53 = vmul.f32 %v183_v50, %v183_v50  ;;  %v189_v54 = vmul.f32 %v185_v3, %v133_v34 }
  0x53   :  { %v188_v55 = vmul.f32 %v184_v51, %v184_v51  ;;  %v190_v40 = vmul.f32 %v186_v52, %v134_v38 }
  0x54   :  { %v191_v56 = vmul.f32 %v187_v53, %v135_v49  ;;  %v199_v57 = vmul.f32 %v225_v37, %v189_v54 }
  0x55   :  { %v192_v58 = vmul.f32 %v188_v55, %v136_v39  ;;  %v200_v42 = vmul.f32 %v225_v37, %v190_v40 }
  0x56   :  { %v201_v59 = vmul.f32 %v225_v37, %v191_v56 }
  0x57   :  { %v202_v60 = vmul.f32 %v225_v37, %v192_v58  ;;  %v204_v61 = vadd.f32 %v200_v42, %v199_v57 }
  0x59   :  { %v205_v62 = vadd.f32 %v204_v61, %v201_v59 }
  0x5b   :  { %v206_v63 = vadd.f32 %v205_v62, %v202_v60 }
  0x5d   :  { %208 = vst [vmem:[#allocation7] sm:$0xff] %v206_v63 }
  0x5e   :  { %307 = shalt.err (!%p304_p0)
}
  0x5f   :  { %218 = dma.vmem_to_hbm [thread:$0]  %s216_s25, 128, %s446_s3, [#allocation4]  }
  0x60   :  { %320 = dma.done.wait [#allocation4], 128  }
  0x61   :  { %321 = vsyncadd [#allocation4], 4294967168 }
  0x62   :  { %222 = vsyncpa [#allocation3], 1 }
  0x63   :  { %223 = vsyncpa [#allocation6], 1 }
  0x64   :  { %224 = vsyncpa [#allocation4], 1 }

</bundles_post_ra>
